<compile_context>
chip_gen: v6e
topology: v6e:2x2x1
jax: 0.10.0
libtpu: 0.0.40
codegen_flags: <defaults>
</compile_context>

<pallas_src>
import functools

import jax
import jax.numpy as jnp
from jax.experimental import pallas as pl
from jax.experimental.pallas import tpu as pltpu


def _round_up(x, m):
    return ((x + m - 1) // m) * m


def classifier_kernel(x_ref, w1_ref, b1_ref, w2_ref, b2_ref, o_ref):
    # x: (TB, Din) f32, w1: (Din, 128) bf16, b1: (1, 128) f32,
    # w2: (1, 128) bf16, b2: (1,) f32 in SMEM, o: (1, TB) f32.

    # In-kernel bf16 cast of the streamed operand (free VPU op; keeps HBM
    # traffic at 4 B/elem without a separate wrapper-side cast pass).
    x = x_ref[...].astype(jnp.bfloat16)

    # dense_1 on the MXU (bf16 operands, f32 accumulate); bias + ReLU on VPU.
    h = jnp.dot(x, w1_ref[...], preferred_element_type=jnp.float32)
    h = jnp.maximum(h + b1_ref[...], 0.0).astype(jnp.bfloat16)    # (TB, 128) bf16

    # dense_2: contract the 128 axis of BOTH operands (q @ k.T pattern) so the
    # MXU emits the lane-dense (1, TB) logit row directly — no (TB,128)
    # transpose and no post-matmul relayout.
    logit = jax.lax.dot_general(
        w2_ref[...], h,
        dimension_numbers=(((1,), (1,)), ((), ())),
        preferred_element_type=jnp.float32)                       # (1, TB) f32
    logit = logit + b2_ref[0]                                     # SMEM scalar bias

    # sigmoid(x) == 0.5 * (tanh(x/2) + 1)  — tanh runs on the EUP slot.
    o_ref[...] = (0.5 * jnp.tanh(0.5 * logit) + 0.5).astype(o_ref.dtype)


@functools.partial(jax.jit, static_argnames=("tb",))
def classifier_forward(feature, w1, b1, w2, b2, *, tb=2048):
    """feature: (B, Din) float -> (B,) float32 probabilities (eval-mode dropout).

    tb: rows per grid step. Must be a multiple of 128 whenever more than one
    tile is needed (lane-dense (1, tb) output blocks). Defaults to 2048, which
    keeps the x double-buffer at 2*tb*Din*4 bytes (~25 MiB at Din=1536) — far
    below VMEM on v5e/v6e/v7x — while amortizing the ~0.35 us per-step
    overhead. For v7x, prefer a tb such that cdiv(B, tb) >= ~8-16 tiles so
    both TensorCores get work; VMEM (64 MiB) is not the constraint here.
    Small batches are automatically handled with a single tile of
    round_up(B, 8) rows.
    """
    B, Din = feature.shape
    H1 = w1.shape[1]                      # 128
    assert w1.shape == (Din, H1)
    assert w2.shape == (H1, 1)

    # Tile selection: clamp to a single tile for small batches (no padding of
    # `feature` is ever materialized — Pallas clips the ragged last tile).
    tb_eff = min(tb, _round_up(B, 8))
    grid = pl.cdiv(B, tb_eff)
    if grid > 1:
        assert tb_eff % 128 == 0, "tb must be a multiple of 128 when B > tb"
    out_cols = grid * tb_eff              # last tile may run past B; sliced below

    # Weight-side casts/reshapes are tiny (Din*128 + 128 elems) — negligible.
    w1_bf = w1.astype(jnp.bfloat16)
    b1_r = b1.reshape(1, H1).astype(jnp.float32)
    w2_r = w2.reshape(1, H1).astype(jnp.bfloat16)   # (H1, 1) -> (1, H1) row
    b2_r = b2.reshape(1).astype(jnp.float32)

    out = pl.pallas_call(
        classifier_kernel,
        out_shape=jax.ShapeDtypeStruct((1, out_cols), jnp.float32),
        grid_spec=pltpu.PrefetchScalarGridSpec(
            num_scalar_prefetch=0,
            grid=(grid,),
            in_specs=[
                # streamed f32 batch tile (double-buffered by Pallas)
                pl.BlockSpec((tb_eff, Din), lambda i: (i, 0)),
                # weights / biases stay resident across the batch loop
                pl.BlockSpec((Din, H1), lambda i: (0, 0)),
                pl.BlockSpec((1, H1), lambda i: (0, 0)),
                pl.BlockSpec((1, H1), lambda i: (0, 0)),
                # scalar second-layer bias lives in SMEM
                pl.BlockSpec(memory_space=pltpu.MemorySpace.SMEM),
            ],
            # lane-dense (1, TB) output slab per tile
            out_specs=pl.BlockSpec((1, tb_eff), lambda i: (0, i)),
        ),
        compiler_params=pltpu.CompilerParams(
            dimension_semantics=("parallel",),        # megacore sharding on v7x
            vmem_limit_bytes=64 * 1024 * 1024,        # headroom for big Din / tb
        ),
    )(feature.astype(jnp.float32), w1_bf, b1_r, w2_r, b2_r)

    return out.reshape(-1)[:B]            # .view(-1) + drop ragged-tile columns


def init_params(key, hidden_size):
    """Deterministic init mimicking nn.Linear (uniform ±1/sqrt(fan_in))."""
    din = hidden_size * 2
    k1, k2, k3, k4 = jax.random.split(key, 4)
    bound1 = 1.0 / jnp.sqrt(din)
    bound2 = 1.0 / jnp.sqrt(128.0)
    w1 = jax.random.uniform(k1, (din, 128), jnp.float32, -bound1, bound1)
    b1 = jax.random.uniform(k2, (128,), jnp.float32, -bound1, bound1)
    w2 = jax.random.uniform(k3, (128, 1), jnp.float32, -bound2, bound2)
    b2 = jax.random.uniform(k4, (1,), jnp.float32, -bound2, bound2)
    return w1, b1, w2, b2


if __name__ == "__main__":
    key = jax.random.PRNGKey(0)
    k_x, k_p = jax.random.split(key)

    hidden_size = 32          # config.hidden_size
    batch = 8
    din = hidden_size * 2     # Classifier input is hidden_size * 2

    feature = jax.random.normal(k_x, (batch, din), dtype=jnp.float32)
    w1, b1, w2, b2 = init_params(k_p, hidden_size)

    out = classifier_forward(feature, w1, b1, w2, b2)
    out = jax.block_until_ready(out)

    # Pure-JAX f32 reference (eval-mode dropout == identity). The kernel runs
    # both matmuls with bf16 operands (f32 accumulate), so allow bf16-level
    # tolerance; downstream consumers should expect ~1e-2 deviation from f32.
    ref = jax.nn.sigmoid(
        jnp.maximum(feature @ w1 + b1, 0.0) @ w2 + b2).reshape(-1)
    assert out.shape == (batch,)
    assert jnp.allclose(out, ref, atol=1e-2), (out, ref)

    print("KERNEL_OK")
</pallas_src>

<mosaic_0001>
module attributes {stable_mosaic.version = 11 : i64} {
  func.func @classifier_kernel(%arg0: i32, %arg1: memref<8x64xf32, #tpu.memory_space<vmem>>, %arg2: memref<64x128xbf16, #tpu.memory_space<vmem>>, %arg3: memref<1x128xf32, #tpu.memory_space<vmem>>, %arg4: memref<1x128xbf16, #tpu.memory_space<vmem>>, %arg5: memref<1xf32, #tpu.memory_space<smem>>, %arg6: memref<1x8xf32, #tpu.memory_space<vmem>>) attributes {dimension_semantics = [#tpu.dimension_semantics<parallel>], iteration_bounds = array<i64: 1>, scalar_prefetch = 0 : i64, scratch_operands = 0 : i64, tpu.core_type = #tpu.core_type<tc>, window_params = [{transform_indices = @transform_0, window_bounds = array<i64: 8, 64>}, {pipeline_mode = #tpu.pipeline_mode<synchronous>, transform_indices = @transform_1, window_bounds = array<i64: 64, 128>}, {pipeline_mode = #tpu.pipeline_mode<synchronous>, transform_indices = @transform_2, window_bounds = array<i64: 1, 128>}, {pipeline_mode = #tpu.pipeline_mode<synchronous>, transform_indices = @transform_3, window_bounds = array<i64: 1, 128>}, {transform_indices = @transform_4, window_bounds = array<i64: 1>}, {transform_indices = @transform_5, window_bounds = array<i64: 1, 8>}]} {
    %c0 = arith.constant 0 : index
    %c0_0 = arith.constant 0 : index
    %0 = vector.load %arg1[%c0, %c0_0] : memref<8x64xf32, #tpu.memory_space<vmem>>, vector<8x64xf32>
    %1 = arith.truncf %0 : vector<8x64xf32> to vector<8x64xbf16>
    %c0_1 = arith.constant 0 : index
    %c0_2 = arith.constant 0 : index
    %2 = vector.load %arg2[%c0_1, %c0_2] : memref<64x128xbf16, #tpu.memory_space<vmem>>, vector<64x128xbf16>
    %cst = arith.constant dense<0.000000e+00> : vector<8x128xf32>
    %3 = tpu.matmul %1, %2, %cst {dimension_numbers = #tpu.dot_dimension_numbers<[1], [0], [0], [1], [0, 0, 1, 1], [], []>} : vector<8x64xbf16>, vector<64x128xbf16>, vector<8x128xf32> -> vector<8x128xf32>
    %c0_3 = arith.constant 0 : index
    %c0_4 = arith.constant 0 : index
    %4 = vector.load %arg3[%c0_3, %c0_4] : memref<1x128xf32, #tpu.memory_space<vmem>>, vector<1x128xf32>
    %5 = vector.broadcast %4 : vector<1x128xf32> to vector<8x128xf32>
    %6 = arith.addf %3, %5 : vector<8x128xf32>
    %cst_5 = arith.constant 0.000000e+00 : f32
    %7 = vector.broadcast %cst_5 : f32 to vector<8x128xf32>
    %8 = arith.maximumf %6, %7 : vector<8x128xf32>
    %9 = arith.truncf %8 : vector<8x128xf32> to vector<8x128xbf16>
    %c0_6 = arith.constant 0 : index
    %c0_7 = arith.constant 0 : index
    %10 = vector.load %arg4[%c0_6, %c0_7] : memref<1x128xbf16, #tpu.memory_space<vmem>>, vector<1x128xbf16>
    %cst_8 = arith.constant dense<0.000000e+00> : vector<1x8xf32>
    %11 = tpu.matmul %10, %9, %cst_8 {dimension_numbers = #tpu.dot_dimension_numbers<[1], [1], [0], [0], [0, 0, 1, 0], [], []>} : vector<1x128xbf16>, vector<8x128xbf16>, vector<1x8xf32> -> vector<1x8xf32>
    %c0_9 = arith.constant 0 : index
    %12 = memref.load %arg5[%c0_9] : memref<1xf32, #tpu.memory_space<smem>>
    %13 = vector.broadcast %12 : f32 to vector<1x8xf32>
    %14 = arith.addf %11, %13 : vector<1x8xf32>
    %cst_10 = arith.constant 5.000000e-01 : f32
    %15 = vector.broadcast %cst_10 : f32 to vector<1x8xf32>
    %16 = arith.mulf %15, %14 : vector<1x8xf32>
    %17 = math.tanh %16 : vector<1x8xf32>
    %cst_11 = arith.constant 5.000000e-01 : f32
    %18 = vector.broadcast %cst_11 : f32 to vector<1x8xf32>
    %19 = arith.mulf %18, %17 : vector<1x8xf32>
    %cst_12 = arith.constant 5.000000e-01 : f32
    %20 = vector.broadcast %cst_12 : f32 to vector<1x8xf32>
    %21 = arith.addf %19, %20 : vector<1x8xf32>
    %c0_13 = arith.constant 0 : index
    %c0_14 = arith.constant 0 : index
    %22 = vector.load %arg6[%c0_13, %c0_14] : memref<1x8xf32, #tpu.memory_space<vmem>>, vector<1x8xf32>
    tpu.vector_store %arg6[%c0_13, %c0_14], %21 {strides = array<i32>} : memref<1x8xf32, #tpu.memory_space<vmem>>, vector<1x8xf32>,
    return
  }
  func.func @transform_0(%arg0: i32) -> (i32, i32) {
    %c0_i32 = arith.constant 0 : i32
    %c0_i32_0 = arith.constant 0 : i32
    return %arg0, %c0_i32 : i32, i32
  }
  func.func @transform_1(%arg0: i32) -> (i32, i32) {
    %c0_i32 = arith.constant 0 : i32
    %c0_i32_0 = arith.constant 0 : i32
    %c0_i32_1 = arith.constant 0 : i32
    return %c0_i32, %c0_i32_0 : i32, i32
  }
  func.func @transform_2(%arg0: i32) -> (i32, i32) {
    %c0_i32 = arith.constant 0 : i32
    %c0_i32_0 = arith.constant 0 : i32
    %c0_i32_1 = arith.constant 0 : i32
    return %c0_i32, %c0_i32_0 : i32, i32
  }
  func.func @transform_3(%arg0: i32) -> (i32, i32) {
    %c0_i32 = arith.constant 0 : i32
    %c0_i32_0 = arith.constant 0 : i32
    %c0_i32_1 = arith.constant 0 : i32
    return %c0_i32, %c0_i32_0 : i32, i32
  }
  func.func @transform_4(%arg0: i32) -> i32 {
    %c0_i32 = arith.constant 0 : i32
    %c0_i32_0 = arith.constant 0 : i32
    return %c0_i32 : i32
  }
  func.func @transform_5(%arg0: i32) -> (i32, i32) {
    %c0_i32 = arith.constant 0 : i32
    %c0_i32_0 = arith.constant 0 : i32
    return %c0_i32, %arg0 : i32, i32
  }
}

</mosaic_0001>

<bundles_post_ra>
// kernel: classifier_forward.1
= control target key start
LH: loop header
LB: loop body
LE: loop exit
PB: predicated region body
PF: predicated region fallthrough
CT: control target
= control target key end

     0   :  { %v235_v1 = vmov 0.0   ;;  %vm236_vm0 = vmmov 0   ;;  %s295_s0 = inlined_call_operand.vmem [shape: f32[8,64], index: 0, kind: input, shape index: {}]   ;;  %s296_s1 = inlined_call_operand.vmem [shape: bf16[64,128], index: 1, kind: input, shape index: {}]   ;;  %s297_s2 = inlined_call_operand.vmem [shape: f32[1,128], index: 2, kind: input, shape index: {}]   ;;  %s298_s3 = inlined_call_operand.vmem [shape: bf16[1,128], index: 3, kind: input, shape index: {}]   ;;  %s299_s4 = inlined_call_operand.<no memory space> [shape: f32[1], index: 4, kind: input, shape index: {}]   ;;  %s300_s5 = inlined_call_operand.hbm [shape: f32[1,8], index: 5, kind: output, shape index: {}]  }
   0x1   :  { %v207_v0 = vld [vmem:[%s296_s1 + $0x18] sm:$0xff]   ;;  %186 = vmatprep.subr.bf16.mxu0 %v235_v1  ;;  %198 = vmatprep.subr.bf16.mxu1 %v235_v1  ;;  %v208_v2 = vld [vmem:[%s296_s1 + $0x10] sm:$0xff]  }
   0x2   :  { %187 = vmatpush3.bf16.msra.mxu0 %v207_v0  ;;  %194 = vmatprep.mubr.msk.bf16.mxu0 %vm236_vm0, %v235_v1 }
   0x3   :  { %188 = vmatprep.subr.bf16.mxu0 %v235_v1  ;;  %200 = vmatprep.mubr.msk.bf16.mxu1 %vm236_vm0, %v235_v1 }
   0x4   :  { %11 = vsyncpa [#allocation4], 0  ;;  %v209_v3 = vld [vmem:[%s296_s1 + $0x8] sm:$0xff]   ;;  %v210_v4 = vld [vmem:[%s296_s1] sm:$0xff]   ;;  %vm64_vm1 = vcmask 523264   ;;  %v112_v16 = vstv %s299_s4  ;;  %vm157_vm2 = vcmask 57344  }
   0x5   :  { %v23_v5 = vld [vmem:[%s295_s0] sm:$0xff] }
   0x6   :  { %189 = vmatpush3.bf16.msra.mxu0 %v208_v2  ;;  %v24_v6 = vpack.c.bf16 %v23_v5, %v23_v5  ;;  %v173_v7 = vld [vmem:[%s297_s2] ss:$0 sm:$0xff]  ;;  %s237_s2 = smov [#allocation3]  }
   0x7   :  { %190 = vmatprep.subr.bf16.mxu0 %v235_v1  ;;  %v110_v15 = vld [vmem:[%s298_s3] sm:$0x1]  ;;  %s165_s7 = sshll.u32 %s237_s2, 4  ;;  %s166_s7 = int_to_ptr.vmem [resolvable:$true] %s165_s7 }
   0x8   :  { %s213_s3 = scalar_lea.vmem %s166_s7, 16  ;;  %s217_s8 = scalar_lea.vmem %s166_s7, 32 }
   0x9   :  { %p214_p0 = scmp.ne.s32.totalorder %s166_s7, %s213_s3  ;;  %p218_p1 = scmp.lt.s32.totalorder %s166_s7, %s166_s7 }
   0xa   :  { %191 = vmatpush3.bf16.msra.mxu0 %v209_v3  ;;  %p219_p2 = scmp.lt.s32.totalorder %s217_s8, %s213_s3 }
   0xb   :  { %192 = vmatprep.subr.bf16.mxu0 %v235_v1 }
   0xc   :  { %p220_p3 = por %p219_p2, %p218_p1 }
   0xe   :  { %193 = vmatpush3.bf16.msra.mxu0 %v210_v4  ;;  %p221_p4 = pnand %p220_p3, %p214_p0 }
  0x11   :  { %195 = vmatmul.mubr.msk.bf16.vlgmr.msra.gmra.mxu0 %vm64_vm1, %v24_v6 }
  0xd1   :  { %v102_v8 = vpop.f32.mrf.mxu0 }
  0xd2   :  { %v103_v9 = vadd.f32 %v173_v7, %v102_v8 }
  0xd3   :  { %v196_v10 = vpop.f32.mrf.mxu0 }
  0xd4   :  { %v108_v11 = vmax.f32 %v103_v9, 0.0 }
  0xd5   :  { %v105_v12 = vpop.f32.mrf.mxu0 }
  0xd6   :  { %v109_v13 = vpack.c.bf16 %v108_v11, %v108_v11 }
  0xd7   :  { %v197_v14 = vpop.f32.mrf.mxu0 }
  0xd8   :  { %199 = vmatpush3.bf16.xpose.msra.mxu1 %v109_v13 }
  0xdf   :  { %201 = vmatmul.mubr.bf16.vlgmr.msra.gmra.mxu1 %v110_v15 }
 0x19f   :  { %v147_v17 = vpop.f32.mrf.mxu1 }
 0x1a0   :  { %v148_v18 = vadd.f32 %v147_v17, %v112_v16 }
 0x1a1   :  { %v202_v19 = vpop.f32.mrf.mxu1 }
 0x1a2   :  { %v153_v20 = vmul.f32 0.5, %v148_v18 }
 0x1a3   :  { %v150_v21 = vpop.f32.mrf.mxu1 }
 0x1a4   :  { %211 = vtanh.f32 %v153_v20 }
 0x1a5   :  { %v203_v22 = vpop.f32.mrf.mxu1 }
 0x1b1   :  { %v212_v23 = vpop.eup %211 }
 0x1b2   :  { %v155_v24 = vmul.f32 0.5, %v212_v23 }
 0x1b4   :  { %v156_v25 = vadd.f32 0.5, %v155_v24 }
 0x1b6   :  { %158 = vst.msk [vmem:[#allocation3] sm:$0x1] %vm157_vm2, %v156_v25 }
 0x1b7   :  { %224 = shalt.err (!%p221_p4)
}
 0x1b8   :  { %168 = dma.vmem_to_hbm [thread:$0]  %s166_s7, 16, %s300_s5, [#allocation4]  }
 0x1b9   :  { %233 = dma.done.wait [#allocation4], 16  }
 0x1ba   :  { %234 = vsyncadd [#allocation4], 4294967280 }
 0x1bb   :  { %172 = vsyncpa [#allocation4], 1 }

</bundles_post_ra>
